<compile_context>
chip_gen: v7x
topology: tpu7x:2x2x1
jax: 0.10.0
libtpu: 0.0.40
codegen_flags: <defaults>
</compile_context>

<pallas_src>
import jax
import jax.numpy as jnp
from jax.experimental import pallas as pl
from jax.experimental.pallas import tpu as pltpu


# ----------------------------- Pallas kernel ------------------------------ #

def prob_block_kernel(g_ref, x_ref, wgT_ref, wxT_ref, bgx_ref, wp_ref, bp_ref,
                      o_ref):
    # g_ref: (1, F_g, TM), x_ref: (1, F_l, TM)  (channels on sublanes, pixels on lanes)
    # wgT_ref: (F_int, F_g), wxT_ref: (F_int, F_l)
    # bgx_ref: (F_int, 1) = bg + bx (folded), wp_ref: (1, F_int), bp_ref: (1, 1)
    g = g_ref[0].astype(jnp.float32)                 # (F_g, TM)
    x = x_ref[0].astype(jnp.float32)                 # (F_l, TM)

    # Channel contraction on the MXU (frees the VALU; kernel becomes HBM-bound).
    acc = (jnp.dot(wgT_ref[...], g, preferred_element_type=jnp.float32)
           + jnp.dot(wxT_ref[...], x, preferred_element_type=jnp.float32)
           + bgx_ref[...])                           # (F_int, TM)
    h = jnp.maximum(acc, 0.0)                        # ReLU

    # psi projection (1 output channel) also on the MXU.
    logit = (jnp.dot(wp_ref[...], h, preferred_element_type=jnp.float32)
             + bp_ref[...])                          # (1, TM)
    psi = jax.nn.sigmoid(logit)                      # f32 elementwise (EUP)

    o_ref[0, :, :] = (x * psi).astype(o_ref.dtype)   # lane-dense store


def prob_block_pallas(g_mat, x_mat, wgT, wxT, b_gx, wp, bp, *, tm, out_dtype):
    """g_mat: (N, F_g, P), x_mat: (N, F_l, P); P % tm == 0; BN-folded weights."""
    N, F_g, P = g_mat.shape
    _, F_l, _ = x_mat.shape
    F_int = wgT.shape[0]
    assert P % tm == 0 and tm % 128 == 0

    full = lambda shape: pl.BlockSpec(shape, lambda n, i: (0, 0))
    return pl.pallas_call(
        prob_block_kernel,
        out_shape=jax.ShapeDtypeStruct((N, F_l, P), out_dtype),
        grid=(N, P // tm),
        in_specs=[
            pl.BlockSpec((1, F_g, tm), lambda n, i: (n, 0, i)),  # g pixel tile
            pl.BlockSpec((1, F_l, tm), lambda n, i: (n, 0, i)),  # x pixel tile
            full((F_int, F_g)),                                  # WgT
            full((F_int, F_l)),                                  # WxT
            full((F_int, 1)),                                    # b_gx = bg + bx
            full((1, F_int)),                                    # wp (psi row)
            full((1, 1)),                                        # bp
        ],
        out_specs=pl.BlockSpec((1, F_l, tm), lambda n, i: (n, 0, i)),
        compiler_params=pltpu.CompilerParams(
            dimension_semantics=("parallel", "parallel")),
    )(g_mat, x_mat, wgT, wxT, b_gx, wp, bp)


# ------------------------------ tile picker -------------------------------- #

def _pick_pixel_tile(P, N, tm_target):
    """Largest multiple of 128 that divides P, capped at tm_target and sized so
    the total grid N*(P//tm) keeps >= ~4 steps (v7x dual-TC balance).
    Returns None if P is not a multiple of 128 (caller falls back to padding)."""
    if P % 128 != 0:
        return None
    units = P // 128
    cap = max(1, tm_target // 128)
    if N * units >= 4:
        cap = min(cap, max(1, (N * units) // 4))
    cap = min(cap, units)
    for d in range(cap, 0, -1):
        if units % d == 0:
            return d * 128
    return 128


# --------------------------- parameter handling ---------------------------- #

def fold_bn_into_conv1x1(w, b, gamma, beta, rmean, rvar, eps=1e-5):
    """w: (Cout, Cin) 1x1-conv weight.  Returns the (Cout, Cin) weight used as
    W^T in the channels-on-sublanes kernel plus the folded bias (Cout,), with
    eval-mode BatchNorm folded in."""
    s = gamma / jnp.sqrt(rvar + eps)                  # (Cout,)
    wT = w * s[:, None]                               # (Cout, Cin)
    b_fold = b * s + (beta - rmean * s)               # (Cout,)
    return wT.astype(jnp.float32), b_fold.astype(jnp.float32)


def make_params(key, F_g, F_l, F_int):
    ks = jax.random.split(key, 9)

    def conv_bn(kw, kb, kbn, cin, cout):
        w = jax.random.normal(kw, (cout, cin), jnp.float32) * 0.1
        b = jax.random.normal(kb, (cout,), jnp.float32) * 0.1
        k1, k2, k3, k4 = jax.random.split(kbn, 4)
        gamma = 1.0 + 0.1 * jax.random.normal(k1, (cout,), jnp.float32)
        beta = 0.1 * jax.random.normal(k2, (cout,), jnp.float32)
        rmean = 0.1 * jax.random.normal(k3, (cout,), jnp.float32)
        rvar = 1.0 + 0.1 * jax.random.uniform(k4, (cout,), jnp.float32)
        return fold_bn_into_conv1x1(w, b, gamma, beta, rmean, rvar)

    wgT, bg = conv_bn(ks[0], ks[1], ks[2], F_g, F_int)      # Wm_g (conv+BN)
    wxT, bx = conv_bn(ks[3], ks[4], ks[5], F_l, F_int)      # Wm_x (conv+BN)
    wp, bp = conv_bn(ks[6], ks[7], ks[8], F_int, 1)         # psi  (conv+BN)

    b_gx = (bg + bx).reshape(F_int, 1)   # fold the two pre-ReLU biases into one
    wp = wp.reshape(1, F_int)            # psi projection as a (1, F_int) row
    bp = bp.reshape(1, 1)
    return wgT, wxT, b_gx, wp, bp


# ------------------------------ wrapper ------------------------------------ #

def prob_block_forward(g_nchw, x_nchw, params, *, tm_target=8192,
                       io_dtype=jnp.float32):
    """io_dtype=jnp.bfloat16 halves HBM traffic on v6e/v7x (kernel is HBM-bound
    after the MXU move); all in-kernel math stays f32 either way."""
    wgT, wxT, b_gx, wp, bp = params
    N, F_g, H, W = g_nchw.shape
    _, F_l, _, _ = x_nchw.shape
    P = H * W

    # NCHW -> (N, C, H*W): pure reshape, no transpose / extra HBM pass.
    g_mat = g_nchw.reshape(N, F_g, P).astype(io_dtype)
    x_mat = x_nchw.reshape(N, F_l, P).astype(io_dtype)

    tm = _pick_pixel_tile(P, N, tm_target)
    if tm is None:
        # Ragged pixel count (H*W not a multiple of 128): pad fallback.
        # TODO(synk): mask the ragged last tile in-kernel instead to avoid the
        # extra pad/slice HBM passes (only hit when H*W % 128 != 0).
        tm = 128
        P_pad = pl.cdiv(P, tm) * tm
        g_mat = jnp.pad(g_mat, ((0, 0), (0, 0), (0, P_pad - P)))
        x_mat = jnp.pad(x_mat, ((0, 0), (0, 0), (0, P_pad - P)))
        out = prob_block_pallas(g_mat, x_mat, wgT, wxT, b_gx, wp, bp,
                                tm=tm, out_dtype=io_dtype)
        return out[:, :, :P].reshape(N, F_l, H, W)

    out = prob_block_pallas(g_mat, x_mat, wgT, wxT, b_gx, wp, bp,
                            tm=tm, out_dtype=io_dtype)
    return out.reshape(N, F_l, H, W)


def prob_block_reference(g_nchw, x_nchw, params):
    """Pure-JAX reference (same folded parameters) for verification."""
    wgT, wxT, b_gx, wp, bp = params
    N, F_g, H, W = g_nchw.shape
    _, F_l, _, _ = x_nchw.shape
    g = g_nchw.reshape(N, F_g, H * W)
    x = x_nchw.reshape(N, F_l, H * W)
    pre = (jnp.einsum('of,nfp->nop', wgT, g)
           + jnp.einsum('ol,nlp->nop', wxT, x) + b_gx[None])
    h = jnp.maximum(pre, 0.0)
    logit = jnp.einsum('oi,nip->nop', wp, h) + bp[None]
    psi = jax.nn.sigmoid(logit)
    return (x * psi).reshape(N, F_l, H, W)


# -------------------------------- main -------------------------------------- #

if __name__ == "__main__":
    F_g, F_l, F_int = 4, 4, 32
    N, H, W = 2, 16, 16

    key = jax.random.PRNGKey(0)
    k_param, k_g, k_x = jax.random.split(key, 3)
    params = make_params(k_param, F_g, F_l, F_int)

    g = jax.random.normal(k_g, (N, F_g, H, W), jnp.float32)
    x = jax.random.normal(k_x, (N, F_l, H, W), jnp.float32)

    ref = prob_block_reference(g, x, params)

    # f32 HBM I/O (safe default on all generations, incl. v5e).
    out = jax.block_until_ready(prob_block_forward(g, x, params))
    assert out.shape == (N, F_l, H, W)
    assert jnp.allclose(out, ref, atol=1e-5, rtol=1e-5), "f32 mismatch vs reference"

    # bf16 HBM I/O variant (recommended on v6e/v7x; kernel math stays f32).
    out_bf16 = jax.block_until_ready(
        prob_block_forward(g, x, params, io_dtype=jnp.bfloat16))
    assert out_bf16.shape == (N, F_l, H, W)
    assert jnp.allclose(out_bf16.astype(jnp.float32), ref, atol=3e-2, rtol=3e-2), \
        "bf16 mismatch vs reference"

    print("KERNEL_OK")
</pallas_src>

<mosaic_0001>
module attributes {stable_mosaic.version = 11 : i64} {
  func.func @prob_block_kernel(%arg0: i32, %arg1: i32, %arg2: memref<1x4x128xf32, #tpu.memory_space<vmem>>, %arg3: memref<1x4x128xf32, #tpu.memory_space<vmem>>, %arg4: memref<32x4xf32, #tpu.memory_space<vmem>>, %arg5: memref<32x4xf32, #tpu.memory_space<vmem>>, %arg6: memref<32x1xf32, #tpu.memory_space<vmem>>, %arg7: memref<1x32xf32, #tpu.memory_space<vmem>>, %arg8: memref<1x1xf32, #tpu.memory_space<vmem>>, %arg9: memref<1x4x128xf32, #tpu.memory_space<vmem>>) attributes {dimension_semantics = [#tpu.dimension_semantics<parallel>, #tpu.dimension_semantics<parallel>], iteration_bounds = array<i64: 2, 2>, scalar_prefetch = 0 : i64, scratch_operands = 0 : i64, tpu.core_type = #tpu.core_type<tc>, window_params = [{transform_indices = @transform_0, window_bounds = array<i64: 1, 4, 128>}, {transform_indices = @transform_1, window_bounds = array<i64: 1, 4, 128>}, {pipeline_mode = #tpu.pipeline_mode<synchronous>, transform_indices = @transform_2, window_bounds = array<i64: 32, 4>}, {pipeline_mode = #tpu.pipeline_mode<synchronous>, transform_indices = @transform_3, window_bounds = array<i64: 32, 4>}, {pipeline_mode = #tpu.pipeline_mode<synchronous>, transform_indices = @transform_4, window_bounds = array<i64: 32, 1>}, {pipeline_mode = #tpu.pipeline_mode<synchronous>, transform_indices = @transform_5, window_bounds = array<i64: 1, 32>}, {pipeline_mode = #tpu.pipeline_mode<synchronous>, transform_indices = @transform_6, window_bounds = array<i64: 1, 1>}, {transform_indices = @transform_7, window_bounds = array<i64: 1, 4, 128>}]} {
    %c0 = arith.constant 0 : index
    %c0_0 = arith.constant 0 : index
    %c0_1 = arith.constant 0 : index
    %0 = vector.load %arg2[%c0, %c0_0, %c0_1] : memref<1x4x128xf32, #tpu.memory_space<vmem>>, vector<1x4x128xf32>
    %1 = vector.shape_cast %0 : vector<1x4x128xf32> to vector<4x128xf32>
    %c0_2 = arith.constant 0 : index
    %c0_3 = arith.constant 0 : index
    %c0_4 = arith.constant 0 : index
    %2 = vector.load %arg3[%c0_2, %c0_3, %c0_4] : memref<1x4x128xf32, #tpu.memory_space<vmem>>, vector<1x4x128xf32>
    %3 = vector.shape_cast %2 : vector<1x4x128xf32> to vector<4x128xf32>
    %c0_5 = arith.constant 0 : index
    %c0_6 = arith.constant 0 : index
    %4 = vector.load %arg4[%c0_5, %c0_6] : memref<32x4xf32, #tpu.memory_space<vmem>>, vector<32x4xf32>
    %cst = arith.constant dense<0.000000e+00> : vector<32x128xf32>
    %5 = tpu.matmul %4, %1, %cst {dimension_numbers = #tpu.dot_dimension_numbers<[1], [0], [0], [1], [0, 0, 1, 1], [], []>} : vector<32x4xf32>, vector<4x128xf32>, vector<32x128xf32> -> vector<32x128xf32>
    %c0_7 = arith.constant 0 : index
    %c0_8 = arith.constant 0 : index
    %6 = vector.load %arg5[%c0_7, %c0_8] : memref<32x4xf32, #tpu.memory_space<vmem>>, vector<32x4xf32>
    %cst_9 = arith.constant dense<0.000000e+00> : vector<32x128xf32>
    %7 = tpu.matmul %6, %3, %cst_9 {dimension_numbers = #tpu.dot_dimension_numbers<[1], [0], [0], [1], [0, 0, 1, 1], [], []>} : vector<32x4xf32>, vector<4x128xf32>, vector<32x128xf32> -> vector<32x128xf32>
    %8 = arith.addf %5, %7 : vector<32x128xf32>
    %c0_10 = arith.constant 0 : index
    %c0_11 = arith.constant 0 : index
    %9 = vector.load %arg6[%c0_10, %c0_11] : memref<32x1xf32, #tpu.memory_space<vmem>>, vector<32x1xf32>
    %10 = vector.broadcast %9 : vector<32x1xf32> to vector<32x128xf32>
    %11 = arith.addf %8, %10 : vector<32x128xf32>
    %cst_12 = arith.constant 0.000000e+00 : f32
    %12 = vector.broadcast %cst_12 : f32 to vector<32x128xf32>
    %13 = arith.maximumf %11, %12 : vector<32x128xf32>
    %c0_13 = arith.constant 0 : index
    %c0_14 = arith.constant 0 : index
    %14 = vector.load %arg7[%c0_13, %c0_14] : memref<1x32xf32, #tpu.memory_space<vmem>>, vector<1x32xf32>
    %cst_15 = arith.constant dense<0.000000e+00> : vector<1x128xf32>
    %15 = tpu.matmul %14, %13, %cst_15 {dimension_numbers = #tpu.dot_dimension_numbers<[1], [0], [0], [1], [0, 0, 1, 1], [], []>} : vector<1x32xf32>, vector<32x128xf32>, vector<1x128xf32> -> vector<1x128xf32>
    %c0_16 = arith.constant 0 : index
    %c0_17 = arith.constant 0 : index
    %16 = vector.load %arg8[%c0_16, %c0_17] : memref<1x1xf32, #tpu.memory_space<vmem>>, vector<1x1xf32>
    %17 = vector.broadcast %16 : vector<1x1xf32> to vector<1x128xf32>
    %18 = arith.addf %15, %17 : vector<1x128xf32>
    %19 = arith.negf %18 : vector<1x128xf32>
    %20 = math.exp %19 : vector<1x128xf32>
    %cst_18 = arith.constant 1.000000e+00 : f32
    %21 = vector.broadcast %cst_18 : f32 to vector<1x128xf32>
    %22 = arith.addf %21, %20 : vector<1x128xf32>
    %23 = arith.divf %21, %22 : vector<1x128xf32>
    %24 = vector.broadcast %23 : vector<1x128xf32> to vector<4x128xf32>
    %25 = arith.mulf %3, %24 : vector<4x128xf32>
    %c0_19 = arith.constant 0 : index
    %c0_20 = arith.constant 0 : index
    %c0_21 = arith.constant 0 : index
    %26 = vector.load %arg9[%c0_19, %c0_20, %c0_21] : memref<1x4x128xf32, #tpu.memory_space<vmem>>, vector<1x4x128xf32>
    %27 = vector.shape_cast %26 : vector<1x4x128xf32> to vector<4x128xf32>
    %28 = vector.shape_cast %25 : vector<4x128xf32> to vector<1x4x128xf32>
    tpu.vector_store %arg9[%c0_19, %c0_20, %c0_21], %28 {strides = array<i32>} : memref<1x4x128xf32, #tpu.memory_space<vmem>>, vector<1x4x128xf32>,
    return
  }
  func.func @transform_0(%arg0: i32, %arg1: i32) -> (i32, i32, i32) {
    %c0_i32 = arith.constant 0 : i32
    %c0_i32_0 = arith.constant 0 : i32
    return %arg0, %c0_i32, %arg1 : i32, i32, i32
  }
  func.func @transform_1(%arg0: i32, %arg1: i32) -> (i32, i32, i32) {
    %c0_i32 = arith.constant 0 : i32
    %c0_i32_0 = arith.constant 0 : i32
    return %arg0, %c0_i32, %arg1 : i32, i32, i32
  }
  func.func @transform_2(%arg0: i32, %arg1: i32) -> (i32, i32) {
    %c0_i32 = arith.constant 0 : i32
    %c0_i32_0 = arith.constant 0 : i32
    %c0_i32_1 = arith.constant 0 : i32
    return %c0_i32, %c0_i32_0 : i32, i32
  }
  func.func @transform_3(%arg0: i32, %arg1: i32) -> (i32, i32) {
    %c0_i32 = arith.constant 0 : i32
    %c0_i32_0 = arith.constant 0 : i32
    %c0_i32_1 = arith.constant 0 : i32
    return %c0_i32, %c0_i32_0 : i32, i32
  }
  func.func @transform_4(%arg0: i32, %arg1: i32) -> (i32, i32) {
    %c0_i32 = arith.constant 0 : i32
    %c0_i32_0 = arith.constant 0 : i32
    %c0_i32_1 = arith.constant 0 : i32
    return %c0_i32, %c0_i32_0 : i32, i32
  }
  func.func @transform_5(%arg0: i32, %arg1: i32) -> (i32, i32) {
    %c0_i32 = arith.constant 0 : i32
    %c0_i32_0 = arith.constant 0 : i32
    %c0_i32_1 = arith.constant 0 : i32
    return %c0_i32, %c0_i32_0 : i32, i32
  }
  func.func @transform_6(%arg0: i32, %arg1: i32) -> (i32, i32) {
    %c0_i32 = arith.constant 0 : i32
    %c0_i32_0 = arith.constant 0 : i32
    %c0_i32_1 = arith.constant 0 : i32
    return %c0_i32, %c0_i32_0 : i32, i32
  }
  func.func @transform_7(%arg0: i32, %arg1: i32) -> (i32, i32, i32) {
    %c0_i32 = arith.constant 0 : i32
    %c0_i32_0 = arith.constant 0 : i32
    return %arg0, %c0_i32, %arg1 : i32, i32, i32
  }
}

</mosaic_0001>

<bundles_post_ra>
// kernel: tpu_custom_call.1
= control target key start
LH: loop header
LB: loop body
LE: loop exit
PB: predicated region body
PF: predicated region fallthrough
CT: control target
= control target key end

     0   :  { %s1284_s0 = inlined_call_operand.vmem [shape: f32[2,4,256], index: 0, kind: input, shape index: {}]   ;;  %s1285_s1 = inlined_call_operand.vmem [shape: f32[2,4,256], index: 1, kind: input, shape index: {}]   ;;  %s1286_s2 = inlined_call_operand.vmem [shape: f32[32,4], index: 2, kind: input, shape index: {}]   ;;  %s1287_s3 = inlined_call_operand.vmem [shape: f32[32,4], index: 3, kind: input, shape index: {}]   ;;  %s1288_s4 = inlined_call_operand.vmem [shape: f32[32,1], index: 4, kind: input, shape index: {}]   ;;  %s1289_s5 = inlined_call_operand.vmem [shape: f32[1,32], index: 5, kind: input, shape index: {}]   ;;  %s1290_s6 = inlined_call_operand.<no memory space> [shape: f32[1,1], index: 6, kind: input, shape index: {}]   ;;  %s1291_s7 = inlined_call_operand.hbm [shape: f32[2,4,256], index: 7, kind: output, shape index: {}]  }
   0x1   :  { %v12_v0 = vstv %s1290_s6 }
   0x2   :  { %13 = vst [vmem:[#allocation2] sm:$0x1] %v12_v0 }
   0x3   :  { %14 = vsyncpa [#allocation4], 0 }
   0x4   :  { %16 = vsyncpa [#allocation4 + $0x1], 0  ;;  %s1092_s26 = smov 0   ;;  %s1094_s27 = smov 0  }
   0x5   :  { %s1096_s28 = smov 0   ;;  %s1098_s29 = smov 0  }
   0x6   :  { %s1100_s30 = smov 0   ;;  %s1102_s8 = smov 0  }
   0x7   :  { %s1104_s9 = smov 0   ;;  %s1106_s10 = smov 0  }
   0x8 LB: > { %1296 = sst [smem:[#allocation6_spill]] %s1034_s8  ;;  %s788_s6 = sadd.s32 4294967295, %s1042_s10   ;;  %s1042_s10 = sphi %s1106_s10, %s22_s10   ;;  %s1038_s9 = sphi %s1104_s9, %s1305_s9   ;;  %s1034_s8 = sphi %s1102_s8, %s1304_s8   ;;  %s1030_s30 = sphi %s1100_s30, %s1303_s30   ;;  %s1026_s29 = sphi %s1098_s29, %s1302_s29   ;;  %s1022_s28 = sphi %s1096_s28, %s1308_s28   ;;  %s1018_s27 = sphi %s1094_s27, %s1307_s27   ;;  %s1014_s26 = sphi %s1092_s26, %s1306_s26  }
   0x9   : > { %1297 = sst [smem:[#allocation7_spill]] %s1038_s9  ;;  %s789_s11 = sadd.s32 4294967294, %s1042_s10  }
   0xa   : > { %s31_s12 = sadd.s32 1, %s1034_s8  ;;  %s34_s13 = sadd.s32 1, %s1038_s9 }
   0xb   : > { %p32_p0 = scmp.ge.s32.totalorder %s31_s12, 2  ;;  %p214_p1 = scmp.ne.s32.totalorder %s1022_s28, %s1018_s27 }
   0xc   : > { %p215_p2 = scmp.eq.s32.totalorder %s788_s6, 3  ;;  %p220_p5 = scmp.ne.s32.totalorder %s1018_s27, %s1014_s26 }
   0xd   : > { %s1310_s12 = smov (%p32_p0, %s31_s12), 0  ;;  %s1312_s13 = smov (!%p32_p0, %s34_s13), %s1038_s9 }
   0xe   : > { %1298 = sst [smem:[#allocation8_spill]] %s1310_s12  ;;  %s200_s14 = ssub.s32 %s1034_s8, %s1310_s12 }
   0xf   : > { %p1143_p3 = por %p215_p2, %p214_p1  ;;  %p36_p4 = scmp.ge.s32.totalorder %s1312_s13, 2 }
  0x10   : > { %p221_p6 = scmp.eq.s32.totalorder %s789_s11, 3  ;;  %p792_p7 = scmp.ge.s32.totalorder %s1042_s10, 1 }
  0x11   : > { %s1314_s13 = smov (%p36_p4, %s1312_s13), 0  ;;  %p276_p9 = scmp.lt.s32.totalorder %s1042_s10, 5 }
  0x12   : > { %1300 = sst [smem:[#allocation9_spill]] %s1314_s13  ;;  %p1152_p8 = por %p221_p6, %p220_p5 }
  0x13   : > { %s199_s17 = ssub.s32 %s1038_s9, %s1314_s13  ;;  %s204_s18 = sadd.s32 1, %s1022_s28 }
  0x14   : > { %s201_s19 = sor.u32 %s200_s14, %s199_s17  ;;  %p277_p10 = pnand %p792_p7, %p276_p9 }
  0x15   : > { %p202_p11 = scmp.eq.s32.totalorder %s201_s19, 0  ;;  %p319_p12 = scmp.lt.s32.totalorder (!%p277_p10), %s1030_s30, 1  ;;  %v341_v1 = vld [vmem:[%s1287_s3] sm:$0xff] (!%p277_p10)  ;;  %vm345_vm0 = vcmask (!%p277_p10), 31744   ;;  %v1044_v3 = vmov (!%p277_p10), 0   ;;  %v549_v5 = vld [vmem:[%s1288_s4 + $0x10] sm:$0xff] (!%p277_p10)  ;;  %v586_v46 = vlaneseq (!%p277_p10) }
  0x16   : > { %280 = sbr.rel (%p277_p10) target bundleno = 525 (0x20d), region = 48  ;;  %p321_p13 = scmp.lt.s32.totalorder (!%p277_p10), %s1026_s29, 1  ;;  %v337_v2 = vld [vmem:[%s1286_s2] sm:$0xff] (!%p277_p10)  ;;  %832 = vmatprep.mubr.msk.f32.mxu1 (!%p277_p10), %vm345_vm0, %v341_v1  ;;  %942 = vset.pattern.permute.xlu0 (!%p277_p10), %v1044_v3  ;;  %v548_v6 = vld [vmem:[%s1288_s4 + $0x8] sm:$0xff] (!%p277_p10)  ;;  %v550_v7 = vld [vmem:[%s1288_s4 + $0x18] sm:$0xff] (!%p277_p10)  ;;  %vm358_vm1 = vcmask (!%p277_p10), 1043456  }
  0x17   : > { %s1161_s20 = scalar_select %p202_p11, %s1022_s28, %s204_s18  }
  0x18   : > { %840 = vmatprep.mubr.msk.f32.mxu0 (!%p277_p10), %vm345_vm0, %v337_v2  ;;  %943 = vset.pattern.permute.xlu1 (!%p277_p10), %v1044_v3  ;;  %v547_v4 = vld [vmem:[%s1288_s4] sm:$0xff] (!%p277_p10)  ;;  %v342_v8 = vld [vmem:[%s1287_s3 + $0x8] sm:$0xff] (!%p277_p10)  ;;  %v343_v12 = vld [vmem:[%s1287_s3 + $0x10] sm:$0xff] (!%p277_p10)  ;;  %v1045_v17 = vmov (!%p277_p10), 0.0|0.0   ;;  %vm1046_vm2 = vmmov (!%p277_p10), 0   ;;  %v1047_v18 = vmov (!%p277_p10), 0.0  }
  0x19   : > { %553 = vperm.xlu0 (!%p277_p10), %942, %v547_v4   ;;  %563 = vperm.xlu1 (!%p277_p10), %943, %v549_v5   ;;  %v338_v11 = vld [vmem:[%s1286_s2 + $0x8] sm:$0xff] (!%p277_p10)  ;;  %v339_v13 = vld [vmem:[%s1286_s2 + $0x10] sm:$0xff] (!%p277_p10)  ;;  %v580_v14 = vld [vmem:[#allocation2] sm:$0x1] (!%p277_p10)  ;;  %vm590_vm3 = vcmask (!%p277_p10), 261120   ;;  %v587_v47 = vshrl.u32 (!%p277_p10), %v586_v46, 7 }
  0x1a   : > { %v344_v15 = vld [vmem:[%s1287_s3 + $0x18] sm:$0xff] (!%p277_p10)  ;;  %v579_v45 = vld [vmem:[%s1289_s5] sm:$0x1] (!%p277_p10)  ;;  %s316_s18 = sand.u32 (!%p277_p10), 1, %s1018_s27  }
  0x1b   : > { %v340_v16 = vld [vmem:[%s1286_s2 + $0x18] sm:$0xff] (!%p277_p10)  ;;  %v588_v48 = vsub.s32 (!%p277_p10), 0, %v587_v47 }
  0x1d   : > { %s320_s25 = scalar_select %p319_p12, %s1030_s30, 1  ;;  %558 = vperm.xlu0 %942, %v548_v6   ;;  %568 = vperm.xlu1 %943, %v550_v7  }
  0x1e   : > { %s322_s6 = scalar_select %p321_p13, %s1026_s29, 1 }
  0x1f   : > { %s794_s19 = sshll.u32 %s320_s25, 1 }
  0x20   : > { %s324_s21 = sadd.s32 %s794_s19, %s322_s6  ;;  %s811_s6 = sshll.u32 %s1030_s30, 1 }
  0x21   : > { %s795_s12 = sshll.u32 %s324_s21, 2  ;;  %583 = vperm.xlu0 %942, %v580_v14   ;;  %s688_s19 = sadd.s32 %s1026_s29, %s811_s6 }
  0x22   : > { %s334_s9 = scalar_lea.vmem %s1285_s1, %s795_s12  ;;  %s326_s25 = scalar_lea.vmem %s1284_s0, %s795_s12 }
  0x23   : > { %v1196_v9 = vld [vmem:[%s334_s9] sm:$0xf]  ;;  %s812_s13 = sshll.u32 %s688_s19, 6  ;;  %s677_s30 = scalar_lea.sflag [#allocation4], %s316_s18 }
  0x24   : > { %v335_v10 = vld [vmem:[%s326_s25] sm:$0xf]  ;;  %830 = vmatprep.subr.msk.mxu1 %vm358_vm1, %v1196_v9  ;;  %s793_s25 = sshll.u32 %s316_s18, 2  ;;  %s1231_s8 = scalar_lea.hbm %s1291_s7, %s812_s13 }
  0x25   : > { %838 = vmatprep.subr.msk.mxu0 %vm358_vm1, %v335_v10  ;;  %831 = vmatpush3.msk.msra.mxu1 %vm358_vm1, %v1196_v9  ;;  %s318_s21 = scalar_lea.vmem [#allocation3], %s793_s25  ;;  %s1048_s9 = smov [#allocation3]  }
  0x26   : > { %839 = vmatpush3.msk.msra.mxu0 %vm358_vm1, %v335_v10  ;;  %833 = vmatmul.mubr.msk.f32.vlgmr.msra.gmra.mrb[0].mxu1 %vm345_vm0, %v342_v8  ;;  %s692_s22 = sshll.u32 %s318_s21, 4  ;;  %s952_s24 = sshll.u32 %s1048_s9, 4  ;;  %s1233_s22 = int_to_ptr.vmem [resolvable:$true] %s692_s22  ;;  %s953_s24 = int_to_ptr.vmem [resolvable:$false] %s952_s24 }
  0x27   : > { %841 = vmatmul.mubr.msk.f32.vlgmr.msra.gmra.mrb[0].mxu0 %vm345_vm0, %v338_v11  ;;  %835 = vmatprep.mubr.msk.f32.mxu1 %vm345_vm0, %v343_v12  ;;  %s948_s29 = scalar_lea.vmem %s1233_s22, 64  ;;  %s954_s11 = scalar_lea.vmem %s953_s24, 128 }
  0x28   : > { %843 = vmatprep.mubr.msk.f32.mxu0 %vm345_vm0, %v339_v13  ;;  %857 = vmatprep.subr.bf16.mxu1 %v1045_v17  ;;  %p949_p0 = scmp.ne.s32.totalorder %s1233_s22, %s948_s29  ;;  %p955_p4 = scmp.lt.s32.totalorder %s1233_s22, %s953_s24 }
  0x29   : > { %p956_p5 = scmp.lt.s32.totalorder %s954_s11, %s948_s29 }
  0x2a   : > { %836 = vmatmul.mubr.msk.f32.gmra.mrb[2].mxu1 %vm345_vm0, %v344_v15  ;;  %p950_p1 = pnand %p949_p0, %p1143_p3 }
  0x2b   : > { %844 = vmatmul.mubr.msk.f32.gmra.mrb[2].mxu0 %vm345_vm0, %v340_v16  ;;  %854 = vmatprep.mubr.msk.f32.mxu1 %vm1046_vm2, %v1047_v18  ;;  %p957_p6 = por %p956_p5, %p955_p4 }
  0x2c   : > { %p951_p2 = pneg %p950_p1 }
  0x2e   : > { %p958_p7 = pnand %p957_p6, %p951_p2 }
  0x98   : > { %v554_v19 = vpop.permute.xlu0 %553  ;;  %v564_v20 = vpop.permute.xlu1 %563 }
  0x9c   : > { %v559_v26 = vpop.permute.xlu0 %558  ;;  %v569_v37 = vpop.permute.xlu1 %568 }
  0xa0   : > { %v584_v49 = vpop.permute.xlu0 %583 }
  0xa1   : > { %v589_v50 = vrot.slane %v584_v49, %v588_v48 }
  0xf9   : > { %v834_v21 = vpop.f32.mrb[0].mxu1 }
  0xfa   : > { %v842_v22 = vpop.f32.mrb[0].mxu0  ;;  %v428_v24 = vpop.f32.mrb[1].mxu1 }
  0xfb   : > { %v534_v23 = vadd.f32 %v842_v22, %v834_v21  ;;  %v528_v25 = vpop.f32.mrb[1].mxu0 }
  0xfc   : > { %v529_v27 = vadd.f32 %v528_v25, %v428_v24 }
  0xfd   : > { %v572_v28 = vadd.f32 %v559_v26, %v534_v23  ;;  %v837_v30 = vpop.f32.mrb[2].mxu1 }
  0xfe   : > { %v571_v29 = vadd.f32 %v554_v19, %v529_v27  ;;  %v845_v31 = vpop.f32.mrb[2].mxu0  ;;  %v438_v34 = vpop.f32.mrb[3].mxu1 }
  0xff   : > { %v576_v32 = vmax.f32 %v572_v28, 0.0  ;;  %v544_v33 = vadd.f32 %v845_v31, %v837_v30  ;;  %v538_v35 = vpop.f32.mrb[3].mxu0 }
 0x100   : > { %v575_v36 = vmax.f32 %v571_v29, 0.0  ;;  %v539_v38 = vadd.f32 %v538_v35, %v438_v34 }
 0x101   : > { %v574_v39 = vadd.f32 %v569_v37, %v544_v33 }
 0x102   : > { %v858_v40 = vpack.c.bf16 %v576_v32, %v575_v36  ;;  %v573_v41 = vadd.f32 %v564_v20, %v539_v38 }
 0x103   : > { %v578_v42 = vmax.f32 %v574_v39, 0.0 }
 0x104   : > { %v577_v43 = vmax.f32 %v573_v41, 0.0  ;;  %859 = vmatpush3.bf16.msra.mxu1 %v858_v40 }
 0x105   : > { %860 = vmatprep.subr.bf16.mxu1 %v1045_v17 }
 0x106   : > { %v861_v44 = vpack.c.bf16 %v578_v42, %v577_v43 }
 0x108   : > { %862 = vmatpush3.bf16.msra.mxu1 %v861_v44 }
 0x10b   : > { %855 = vmatmul.mubr.msk.f32.vlgmr.msra.gmra.mrb[4].mxu1 %vm590_vm3, %v579_v45 }
 0x1de   : > { %v660_v51 = vpop.f32.mrb[4].mxu1 }
 0x1df   : > { %v661_v52 = vadd.f32 %v660_v51, %v589_v50  ;;  %v856_v53 = vpop.f32.mrb[5].mxu1 }
 0x1e1   : > { %v809_v54 = vmul.f32 -1.442695, %v661_v52 }
 0x1e3   : > { %944 = vpow2.f32 %v809_v54 }
 0x1ed   : > { %v945_v55 = vpop.eup %944 }
 0x1ee   : > { %v667_v56 = vadd.f32 1.0, %v945_v55 }
 0x1f0   : > { %946 = vrcp.f32 %v667_v56 }
 0x1fa   : > { %v947_v57 = vpop.eup %946 }
 0x1fb   : > { %v673_v58 = vrot.slane %v947_v57, %v588_v48 }
 0x1fd   : > { %v674_v59 = vmul.f32 %v673_v58, %v1196_v9 }
 0x1ff   : > { %675 = vst [vmem:[%s318_s21] sm:$0xf] %v674_v59 }
 0x200   : > { %961 = shalt.err (!%p958_p7)
}
 0x201   : > { %s962_s14 = scalar_lea.hbm %s1231_s8, 64  ;;  %s966_s25 = scalar_lea.hbm %s1291_s7, 256 }
 0x202   : > { %p963_p9 = scmp.ne.s32.totalorder %s1231_s8, %s962_s14  ;;  %p967_p12 = scmp.lt.u32.totalorder %s1231_s8, %s1291_s7 }
 0x203   : > { %p968_p13 = scmp.lt.u32.totalorder %s966_s25, %s962_s14  ;;  %p970_p1 = scmp.lt.u32.totalorder %s962_s14, %s1231_s8 }
 0x204   : > { %p964_p10 = pnand %p963_p9, %p1143_p3 }
 0x205   : > { %p969_p0 = por %p968_p13, %p967_p12 }
 0x206   : > { %p965_p11 = pneg %p964_p10 }
 0x207   : > { %p971_p2 = por %p970_p1, %p969_p0 }
 0x209   : > { %p972_p4 = pnand %p971_p2, %p965_p11 }
 0x20b   : > { %975 = shalt.err (!%p972_p4)
}
 0x20c   : > { %867 = dma.vmem_to_hbm [thread:$0]  (%p1143_p3), %s1233_s22, 64, %s1231_s8, %s677_s30  }
 0x20d PF: > { %p873_p5 = scmp.ge.s32.totalorder %s1042_s10, 2  ;;  %s704_s13 = sand.u32 1, %s1014_s26  }
 0x20e   : > { %s705_s21 = scalar_lea.sflag [#allocation4], %s704_s13 }
 0x20f   : > { %p870_p6 = pnand %p873_p5, %p1152_p8 }
 0x211   : > { %1009 = dma.done.wait (!%p870_p6), %s705_s21, 64  }
 0x212   : > { %1011 = vsyncadd (!%p870_p6), %s705_s21, 4294967232  ;;  %s22_s10 = sadd.s32 1, %s1042_s10   ;;  %s1302_s29 = sld [smem:[#allocation6_spill]] }
 0x213   : > { %p19_p7 = scmp.ge.s32.totalorder %s22_s10, 6   ;;  %s1303_s30 = sld [smem:[#allocation7_spill]] }
 0x214   : > { %s1304_s8 = sld [smem:[#allocation8_spill]]  ;;  %s1305_s9 = sld [smem:[#allocation9_spill]] }
 0x215   : > { %s1306_s26 = smov %s1018_s27  ;;  %s1307_s27 = smov %s1022_s28 }
 0x216   : > { %s1308_s28 = smov %s1161_s20  ;;  %21 = sbr.rel (!%p19_p7) target bundleno = 8 (0x8), region = 86 }
 0x21d   :  { %710 = vsyncpa [#allocation4], 1 }
 0x21e   :  { %712 = vsyncpa [#allocation4 + $0x1], 1 }

</bundles_post_ra>
